<compile_context>
chip_gen: v6e
topology: v6e:2x2x1
jax: 0.10.0
libtpu: 0.0.40
codegen_flags: <defaults>
</compile_context>

<pallas_src>
import jax
import jax.numpy as jnp
from jax.experimental import pallas as pl
from jax.experimental.pallas import tpu as pltpu


def _round_up(a, b):
    return ((a + b - 1) // b) * b


def _leaky_relu(x, negative_slope=0.1):
    # exact for slope in (0, 1)
    return jnp.maximum(x, negative_slope * x)


# --------------------------------------------------------------------------- #
# Kernel: whole 4-layer MLP for one batch tile.
# --------------------------------------------------------------------------- #
def _ee_delta_decoder_kernel(
    x_ref,
    w1_ref, b1_ref,
    w2_ref, b2_ref,
    w3_ref, b3_ref,
    w4_ref, b4_ref,
    o_ref,
):
    cdt = w1_ref.dtype  # MXU compute dtype (bf16 by default)

    # in-kernel cast of x (free VPU op; avoids a wrapper-side HBM pass)
    h = jnp.dot(x_ref[...].astype(cdt), w1_ref[...],
                preferred_element_type=jnp.float32)
    h = _leaky_relu(h + b1_ref[...])

    h = jnp.dot(h.astype(cdt), w2_ref[...], preferred_element_type=jnp.float32)
    h = _leaky_relu(h + b2_ref[...])

    h = jnp.dot(h.astype(cdt), w3_ref[...], preferred_element_type=jnp.float32)
    h = _leaky_relu(h + b3_ref[...])

    out = jnp.dot(h.astype(cdt), w4_ref[...], preferred_element_type=jnp.float32)
    o_ref[...] = (out + b4_ref[...]).astype(o_ref.dtype)


# --------------------------------------------------------------------------- #
# Hardware query (best effort): number of TensorCores per device.
# v5e / v6e -> 1, v7x -> 2.  Falls back to 1; can be overridden explicitly.
# --------------------------------------------------------------------------- #
def _detect_num_tensorcores():
    try:
        dev = jax.devices()[0]
        for attr in ("num_cores", "core_count"):
            v = getattr(dev, attr, None)
            if isinstance(v, int) and v > 0:
                return v
    except Exception:
        pass
    try:
        info = pltpu.get_tpu_info()
        for attr in ("num_cores", "num_tensorcores", "tensorcore_count",
                     "cores_per_chip"):
            v = getattr(info, attr, None)
            if isinstance(v, int) and v > 0:
                return v
    except Exception:
        pass
    return 1


# --------------------------------------------------------------------------- #
# One-time parameter preparation (do this OUTSIDE the hot path).
# Weights stored [in, out] in the MXU compute dtype; biases f32 [1, out].
# --------------------------------------------------------------------------- #
def prepare_params(params, compute_dtype=jnp.bfloat16):
    prepared = {}
    for i in range(1, 5):
        w = jnp.asarray(params[f"w{i}"])
        b = jnp.asarray(params[f"b{i}"])
        if b.ndim == 1:
            b = b[None, :]
        prepared[f"w{i}"] = w.astype(compute_dtype)
        prepared[f"b{i}"] = b.astype(jnp.float32)
    return prepared


# --------------------------------------------------------------------------- #
# Wrapper
# --------------------------------------------------------------------------- #
def ee_delta_decoder(x, params, *, batch_tile=1024, use_bf16=True,
                     num_tensorcores=None):
    """x: [B, z_dim] float32.  params: w1..w4 [in,out], b1..b4 [out] or [1,out].

    Returns [B, action_dim] float32 (exact shape; no padding, no post-slice).
    """
    B, z_dim = x.shape
    action_dim = jnp.asarray(params["w4"]).shape[1]
    compute_dtype = jnp.bfloat16 if use_bf16 else jnp.float32

    # Cast only if needed (zero ops when params come from prepare_params()).
    def _cvt(a, dt):
        a = jnp.asarray(a)
        return a if a.dtype == dt else a.astype(dt)

    ws, bs = [], []
    for i in range(1, 5):
        ws.append(_cvt(params[f"w{i}"], compute_dtype))
        b = jnp.asarray(params[f"b{i}"])
        if b.ndim == 1:
            b = b[None, :]
        bs.append(_cvt(b, jnp.float32))
    w1, w2, w3, w4 = ws
    b1, b2, b3, b4 = bs

    # ---- batch tiling --------------------------------------------------------
    if num_tensorcores is None:
        num_tensorcores = _detect_num_tensorcores()
    batch_tile = max(8, _round_up(batch_tile, 8))
    b8 = _round_up(B, 8)
    steps = pl.cdiv(b8, batch_tile)
    # Only split a small batch across grid steps when there are multiple
    # TensorCores to shard the "parallel" axis over (v7x); on v5e/v6e the grid
    # is a serial loop and a split is pure per-step overhead.
    if num_tensorcores > 1 and b8 >= 8 * num_tensorcores:
        steps = _round_up(max(steps, num_tensorcores), num_tensorcores)
    tile = _round_up(pl.cdiv(b8, steps), 8)

    if tile >= B:
        # Single block covering the whole batch (block dim == full array dim,
        # so no divisibility constraint and no ragged handling needed).
        tile = B
        grid = (1,)
    else:
        # cdiv grid: Pallas clips the last block's reads and drops its
        # out-of-bounds writes, so no batch padding is required.
        grid = (pl.cdiv(B, tile),)

    x_spec = pl.BlockSpec((tile, z_dim), lambda i: (i, 0))
    out_spec = pl.BlockSpec((tile, action_dim), lambda i: (i, 0))

    def full_spec(arr):
        # Constant block index -> weights/biases stay resident in VMEM across
        # grid steps (no re-DMA).
        return pl.BlockSpec(arr.shape, lambda i: (0,) * arr.ndim)

    in_specs = [
        x_spec,
        full_spec(w1), full_spec(b1),
        full_spec(w2), full_spec(b2),
        full_spec(w3), full_spec(b3),
        full_spec(w4), full_spec(b4),
    ]

    out = pl.pallas_call(
        _ee_delta_decoder_kernel,
        out_shape=jax.ShapeDtypeStruct((B, action_dim), jnp.float32),
        grid=grid,
        in_specs=in_specs,
        out_specs=out_spec,
        compiler_params=pltpu.CompilerParams(
            dimension_semantics=("parallel",),
        ),
    )(x, w1, b1, w2, b2, w3, b3, w4, b4)

    return out


# --------------------------------------------------------------------------- #
# Synthetic init (stand-in for init_weights in the PyTorch module) + reference
# --------------------------------------------------------------------------- #
def init_params(key, z_dim, action_dim):
    dims = [(z_dim, 128), (128, 64), (64, 32), (32, action_dim)]
    params = {}
    for idx, (fan_in, fan_out) in enumerate(dims, start=1):
        key, kw, kb = jax.random.split(key, 3)
        scale = jnp.sqrt(2.0 / fan_in)
        params[f"w{idx}"] = (
            jax.random.normal(kw, (fan_in, fan_out), jnp.float32) * scale
        )
        params[f"b{idx}"] = (
            jax.random.normal(kb, (1, fan_out), jnp.float32) * 0.01
        )
    return params


def reference_forward(x, params, compute_dtype=jnp.float32):
    """Pure-JAX reference with the same dtype strategy as the kernel."""
    h = x
    for idx in range(1, 5):
        w = jnp.asarray(params[f"w{idx}"]).astype(compute_dtype)
        b = jnp.asarray(params[f"b{idx}"]).astype(jnp.float32)
        if b.ndim == 1:
            b = b[None, :]
        h = jnp.dot(h.astype(compute_dtype), w,
                    preferred_element_type=jnp.float32) + b
        if idx < 4:
            h = jnp.maximum(h, 0.1 * h)
    return h


if __name__ == "__main__":
    z_dim, action_dim = 32, 8

    key = jax.random.PRNGKey(0)
    kp, kx1, kx2, kx3 = jax.random.split(key, 4)
    params = init_params(kp, z_dim, action_dim)
    prepared = prepare_params(params)   # one-time weight cast, outside hot path

    # 1) small batch -> single grid step (or a 2-way split on a multi-TC chip)
    x1 = jax.random.normal(kx1, (16, z_dim), jnp.float32)
    out1 = jax.block_until_ready(ee_delta_decoder(x1, prepared))
    assert out1.shape == (16, action_dim)
    ref1 = reference_forward(x1, params, jnp.bfloat16)
    assert jnp.allclose(out1, ref1, atol=2e-2, rtol=2e-2), "mismatch (small batch)"

    # 2) ragged batch + multi-step cdiv grid (last block clipped by Pallas)
    x2 = jax.random.normal(kx2, (37, z_dim), jnp.float32)
    out2 = jax.block_until_ready(ee_delta_decoder(x2, prepared, batch_tile=16))
    assert out2.shape == (37, action_dim)
    ref2 = reference_forward(x2, params, jnp.bfloat16)
    assert jnp.allclose(out2, ref2, atol=2e-2, rtol=2e-2), "mismatch (ragged batch)"

    # 3) forced 2-TensorCore split path (correct on any chip; sharded on v7x)
    x3 = jax.random.normal(kx3, (48, z_dim), jnp.float32)
    out3 = jax.block_until_ready(
        ee_delta_decoder(x3, prepared, num_tensorcores=2))
    assert out3.shape == (48, action_dim)
    ref3 = reference_forward(x3, params, jnp.bfloat16)
    assert jnp.allclose(out3, ref3, atol=2e-2, rtol=2e-2), "mismatch (2-TC split)"

    print("KERNEL_OK")
</pallas_src>

<mosaic_0001>
module attributes {stable_mosaic.version = 11 : i64} {
  func.func @_ee_delta_decoder_kernel(%arg0: i32, %arg1: memref<16x32xf32, #tpu.memory_space<vmem>>, %arg2: memref<32x128xbf16, #tpu.memory_space<vmem>>, %arg3: memref<1x128xf32, #tpu.memory_space<vmem>>, %arg4: memref<128x64xbf16, #tpu.memory_space<vmem>>, %arg5: memref<1x64xf32, #tpu.memory_space<vmem>>, %arg6: memref<64x32xbf16, #tpu.memory_space<vmem>>, %arg7: memref<1x32xf32, #tpu.memory_space<vmem>>, %arg8: memref<32x8xbf16, #tpu.memory_space<vmem>>, %arg9: memref<1x8xf32, #tpu.memory_space<vmem>>, %arg10: memref<16x8xf32, #tpu.memory_space<vmem>>) attributes {dimension_semantics = [#tpu.dimension_semantics<parallel>], iteration_bounds = array<i64: 1>, scalar_prefetch = 0 : i64, scratch_operands = 0 : i64, tpu.core_type = #tpu.core_type<tc>, window_params = [{transform_indices = @transform_0, window_bounds = array<i64: 16, 32>}, {pipeline_mode = #tpu.pipeline_mode<synchronous>, transform_indices = @transform_1, window_bounds = array<i64: 32, 128>}, {pipeline_mode = #tpu.pipeline_mode<synchronous>, transform_indices = @transform_2, window_bounds = array<i64: 1, 128>}, {pipeline_mode = #tpu.pipeline_mode<synchronous>, transform_indices = @transform_3, window_bounds = array<i64: 128, 64>}, {pipeline_mode = #tpu.pipeline_mode<synchronous>, transform_indices = @transform_4, window_bounds = array<i64: 1, 64>}, {pipeline_mode = #tpu.pipeline_mode<synchronous>, transform_indices = @transform_5, window_bounds = array<i64: 64, 32>}, {pipeline_mode = #tpu.pipeline_mode<synchronous>, transform_indices = @transform_6, window_bounds = array<i64: 1, 32>}, {pipeline_mode = #tpu.pipeline_mode<synchronous>, transform_indices = @transform_7, window_bounds = array<i64: 32, 8>}, {pipeline_mode = #tpu.pipeline_mode<synchronous>, transform_indices = @transform_8, window_bounds = array<i64: 1, 8>}, {transform_indices = @transform_9, window_bounds = array<i64: 16, 8>}]} {
    %c0 = arith.constant 0 : index
    %c0_0 = arith.constant 0 : index
    %0 = vector.load %arg1[%c0, %c0_0] : memref<16x32xf32, #tpu.memory_space<vmem>>, vector<16x32xf32>
    %1 = arith.truncf %0 : vector<16x32xf32> to vector<16x32xbf16>
    %c0_1 = arith.constant 0 : index
    %c0_2 = arith.constant 0 : index
    %2 = vector.load %arg2[%c0_1, %c0_2] : memref<32x128xbf16, #tpu.memory_space<vmem>>, vector<32x128xbf16>
    %cst = arith.constant dense<0.000000e+00> : vector<16x128xf32>
    %3 = tpu.matmul %1, %2, %cst {dimension_numbers = #tpu.dot_dimension_numbers<[1], [0], [0], [1], [0, 0, 1, 1], [], []>} : vector<16x32xbf16>, vector<32x128xbf16>, vector<16x128xf32> -> vector<16x128xf32>
    %c0_3 = arith.constant 0 : index
    %c0_4 = arith.constant 0 : index
    %4 = vector.load %arg3[%c0_3, %c0_4] : memref<1x128xf32, #tpu.memory_space<vmem>>, vector<1x128xf32>
    %5 = vector.broadcast %4 : vector<1x128xf32> to vector<16x128xf32>
    %6 = arith.addf %3, %5 : vector<16x128xf32>
    %cst_5 = arith.constant 1.000000e-01 : f32
    %7 = vector.broadcast %cst_5 : f32 to vector<16x128xf32>
    %8 = arith.mulf %7, %6 : vector<16x128xf32>
    %9 = arith.maximumf %6, %8 : vector<16x128xf32>
    %10 = arith.truncf %9 : vector<16x128xf32> to vector<16x128xbf16>
    %c0_6 = arith.constant 0 : index
    %c0_7 = arith.constant 0 : index
    %11 = vector.load %arg4[%c0_6, %c0_7] : memref<128x64xbf16, #tpu.memory_space<vmem>>, vector<128x64xbf16>
    %cst_8 = arith.constant dense<0.000000e+00> : vector<16x64xf32>
    %12 = tpu.matmul %10, %11, %cst_8 {dimension_numbers = #tpu.dot_dimension_numbers<[1], [0], [0], [1], [0, 0, 1, 1], [], []>} : vector<16x128xbf16>, vector<128x64xbf16>, vector<16x64xf32> -> vector<16x64xf32>
    %c0_9 = arith.constant 0 : index
    %c0_10 = arith.constant 0 : index
    %13 = vector.load %arg5[%c0_9, %c0_10] : memref<1x64xf32, #tpu.memory_space<vmem>>, vector<1x64xf32>
    %14 = vector.broadcast %13 : vector<1x64xf32> to vector<16x64xf32>
    %15 = arith.addf %12, %14 : vector<16x64xf32>
    %cst_11 = arith.constant 1.000000e-01 : f32
    %16 = vector.broadcast %cst_11 : f32 to vector<16x64xf32>
    %17 = arith.mulf %16, %15 : vector<16x64xf32>
    %18 = arith.maximumf %15, %17 : vector<16x64xf32>
    %19 = arith.truncf %18 : vector<16x64xf32> to vector<16x64xbf16>
    %c0_12 = arith.constant 0 : index
    %c0_13 = arith.constant 0 : index
    %20 = vector.load %arg6[%c0_12, %c0_13] : memref<64x32xbf16, #tpu.memory_space<vmem>>, vector<64x32xbf16>
    %cst_14 = arith.constant dense<0.000000e+00> : vector<16x32xf32>
    %21 = tpu.matmul %19, %20, %cst_14 {dimension_numbers = #tpu.dot_dimension_numbers<[1], [0], [0], [1], [0, 0, 1, 1], [], []>} : vector<16x64xbf16>, vector<64x32xbf16>, vector<16x32xf32> -> vector<16x32xf32>
    %c0_15 = arith.constant 0 : index
    %c0_16 = arith.constant 0 : index
    %22 = vector.load %arg7[%c0_15, %c0_16] : memref<1x32xf32, #tpu.memory_space<vmem>>, vector<1x32xf32>
    %23 = vector.broadcast %22 : vector<1x32xf32> to vector<16x32xf32>
    %24 = arith.addf %21, %23 : vector<16x32xf32>
    %cst_17 = arith.constant 1.000000e-01 : f32
    %25 = vector.broadcast %cst_17 : f32 to vector<16x32xf32>
    %26 = arith.mulf %25, %24 : vector<16x32xf32>
    %27 = arith.maximumf %24, %26 : vector<16x32xf32>
    %28 = arith.truncf %27 : vector<16x32xf32> to vector<16x32xbf16>
    %c0_18 = arith.constant 0 : index
    %c0_19 = arith.constant 0 : index
    %29 = vector.load %arg8[%c0_18, %c0_19] : memref<32x8xbf16, #tpu.memory_space<vmem>>, vector<32x8xbf16>
    %cst_20 = arith.constant dense<0.000000e+00> : vector<16x8xf32>
    %30 = tpu.matmul %28, %29, %cst_20 {dimension_numbers = #tpu.dot_dimension_numbers<[1], [0], [0], [1], [0, 0, 1, 1], [], []>} : vector<16x32xbf16>, vector<32x8xbf16>, vector<16x8xf32> -> vector<16x8xf32>
    %c0_21 = arith.constant 0 : index
    %c0_22 = arith.constant 0 : index
    %31 = vector.load %arg9[%c0_21, %c0_22] : memref<1x8xf32, #tpu.memory_space<vmem>>, vector<1x8xf32>
    %32 = vector.broadcast %31 : vector<1x8xf32> to vector<16x8xf32>
    %33 = arith.addf %30, %32 : vector<16x8xf32>
    %c0_23 = arith.constant 0 : index
    %c0_24 = arith.constant 0 : index
    %34 = vector.load %arg10[%c0_23, %c0_24] : memref<16x8xf32, #tpu.memory_space<vmem>>, vector<16x8xf32>
    tpu.vector_store %arg10[%c0_23, %c0_24], %33 {strides = array<i32>} : memref<16x8xf32, #tpu.memory_space<vmem>>, vector<16x8xf32>,
    return
  }
  func.func @transform_0(%arg0: i32) -> (i32, i32) {
    %c0_i32 = arith.constant 0 : i32
    %c0_i32_0 = arith.constant 0 : i32
    return %arg0, %c0_i32 : i32, i32
  }
  func.func @transform_1(%arg0: i32) -> (i32, i32) {
    %c0_i32 = arith.constant 0 : i32
    %c0_i32_0 = arith.constant 0 : i32
    %c0_i32_1 = arith.constant 0 : i32
    return %c0_i32, %c0_i32_0 : i32, i32
  }
  func.func @transform_2(%arg0: i32) -> (i32, i32) {
    %c0_i32 = arith.constant 0 : i32
    %c0_i32_0 = arith.constant 0 : i32
    %c0_i32_1 = arith.constant 0 : i32
    return %c0_i32, %c0_i32_0 : i32, i32
  }
  func.func @transform_3(%arg0: i32) -> (i32, i32) {
    %c0_i32 = arith.constant 0 : i32
    %c0_i32_0 = arith.constant 0 : i32
    %c0_i32_1 = arith.constant 0 : i32
    return %c0_i32, %c0_i32_0 : i32, i32
  }
  func.func @transform_4(%arg0: i32) -> (i32, i32) {
    %c0_i32 = arith.constant 0 : i32
    %c0_i32_0 = arith.constant 0 : i32
    %c0_i32_1 = arith.constant 0 : i32
    return %c0_i32, %c0_i32_0 : i32, i32
  }
  func.func @transform_5(%arg0: i32) -> (i32, i32) {
    %c0_i32 = arith.constant 0 : i32
    %c0_i32_0 = arith.constant 0 : i32
    %c0_i32_1 = arith.constant 0 : i32
    return %c0_i32, %c0_i32_0 : i32, i32
  }
  func.func @transform_6(%arg0: i32) -> (i32, i32) {
    %c0_i32 = arith.constant 0 : i32
    %c0_i32_0 = arith.constant 0 : i32
    %c0_i32_1 = arith.constant 0 : i32
    return %c0_i32, %c0_i32_0 : i32, i32
  }
  func.func @transform_7(%arg0: i32) -> (i32, i32) {
    %c0_i32 = arith.constant 0 : i32
    %c0_i32_0 = arith.constant 0 : i32
    %c0_i32_1 = arith.constant 0 : i32
    return %c0_i32, %c0_i32_0 : i32, i32
  }
  func.func @transform_8(%arg0: i32) -> (i32, i32) {
    %c0_i32 = arith.constant 0 : i32
    %c0_i32_0 = arith.constant 0 : i32
    %c0_i32_1 = arith.constant 0 : i32
    return %c0_i32, %c0_i32_0 : i32, i32
  }
  func.func @transform_9(%arg0: i32) -> (i32, i32) {
    %c0_i32 = arith.constant 0 : i32
    %c0_i32_0 = arith.constant 0 : i32
    return %arg0, %c0_i32 : i32, i32
  }
}

</mosaic_0001>

<bundles_post_ra>
// kernel: tpu_custom_call.1
= control target key start
LH: loop header
LB: loop body
LE: loop exit
PB: predicated region body
PF: predicated region fallthrough
CT: control target
= control target key end

     0   :  { %v498_v0 = vmov 0.0   ;;  %vm499_vm0 = vmmov 0   ;;  %vm59_vm1 = vcmask 261120   ;;  %vm265_vm2 = vcmask 523264   ;;  %s648_s1 = inlined_call_operand.vmem [shape: bf16[32,128], index: 1, kind: input, shape index: {}]   ;;  %s649_s0 = inlined_call_operand.vmem [shape: f32[16,32], index: 0, kind: input, shape index: {}]   ;;  %s650_s3 = inlined_call_operand.vmem [shape: bf16[128,64], index: 3, kind: input, shape index: {}]   ;;  %s651_s5 = inlined_call_operand.vmem [shape: bf16[64,32], index: 5, kind: input, shape index: {}]   ;;  %s652_s2 = inlined_call_operand.vmem [shape: f32[1,128], index: 2, kind: input, shape index: {}]   ;;  %s653_s4 = inlined_call_operand.vmem [shape: f32[1,64], index: 4, kind: input, shape index: {}]   ;;  %s654_s7 = inlined_call_operand.vmem [shape: bf16[32,8], index: 7, kind: input, shape index: {}]   ;;  %s655_s6 = inlined_call_operand.vmem [shape: f32[1,32], index: 6, kind: input, shape index: {}]   ;;  %s656_s8 = inlined_call_operand.vmem [shape: f32[1,8], index: 8, kind: input, shape index: {}]   ;;  %s657_s9 = inlined_call_operand.vmem [shape: f32[16,8], index: 9, kind: output, shape index: {}]  }
   0x1   :  { %432 = vmatprep.subr.bf16.mxu0 %v498_v0  ;;  %v482_v1 = vld [vmem:[%s648_s1 + $0x8] sm:$0xff]   ;;  %436 = vmatprep.mubr.msk.bf16.mxu0 %vm499_vm0, %v498_v0  ;;  %v483_v2 = vld [vmem:[%s648_s1] sm:$0xff]   ;;  %v484_v5 = vld [vmem:[%s650_s3 + $0x38] sm:$0xff]   ;;  %vm382_vm3 = vcmask 64512  }
   0x2   :  { %440 = vmatprep.subr.bf16.mxu1 %v498_v0  ;;  %456 = vmatprep.mubr.msk.bf16.mxu1 %vm499_vm0, %v498_v0  ;;  %v33_v3 = vld [vmem:[%s649_s0] sm:$0xff]  ;;  %v34_v4 = vld [vmem:[%s649_s0 + $0x8] sm:$0xff]  ;;  %v485_v7 = vld [vmem:[%s650_s3 + $0x30] sm:$0xff]  }
   0x3   :  { %433 = vmatpush3.bf16.msra.mxu0 %v482_v1  ;;  %v35_v6 = vpack.c.bf16 %v34_v4, %v33_v3  ;;  %441 = vmatpush3.bf16.msra.mxu1 %v484_v5  ;;  %v486_v8 = vld [vmem:[%s650_s3 + $0x28] sm:$0xff]   ;;  %v487_v9 = vld [vmem:[%s650_s3 + $0x20] sm:$0xff]   ;;  %v488_v10 = vld [vmem:[%s650_s3 + $0x18] sm:$0xff]  }
   0x4   :  { %434 = vmatprep.subr.bf16.mxu0 %v498_v0  ;;  %442 = vmatprep.subr.bf16.mxu1 %v498_v0  ;;  %v489_v11 = vld [vmem:[%s650_s3 + $0x10] sm:$0xff]   ;;  %v490_v12 = vld [vmem:[%s650_s3 + $0x8] sm:$0xff]   ;;  %v491_v13 = vld [vmem:[%s650_s3] sm:$0xff]  }
   0x5   :  { %v492_v14 = vld [vmem:[%s651_s5 + $0x18] sm:$0xff]   ;;  %v389_v15 = vld [vmem:[%s652_s2] ss:$0 sm:$0xff]  ;;  %v493_v27 = vld [vmem:[%s651_s5 + $0x10] sm:$0xff]  }
   0x6   :  { %v494_v28 = vld [vmem:[%s651_s5 + $0x8] sm:$0xff]   ;;  %v495_v29 = vld [vmem:[%s651_s5] sm:$0xff]  }
   0x7   :  { %435 = vmatpush3.bf16.msra.mxu0 %v483_v2  ;;  %443 = vmatpush3.bf16.msra.mxu1 %v485_v7  ;;  %v393_v30 = vld [vmem:[%s653_s4] ss:$0 sm:$0xff]  ;;  %v496_v42 = vld [vmem:[%s654_s7 + $0x8] sm:$0xff]  }
   0x8   :  { %460 = vmatprep.subr.bf16.mxu0 %v498_v0  ;;  %444 = vmatprep.subr.bf16.mxu1 %v498_v0  ;;  %v497_v43 = vld [vmem:[%s654_s7] sm:$0xff]  }
   0x9   :  { %v402_v44 = vld [vmem:[%s655_s6] ss:$0 sm:$0xff] }
   0xa   :  { %437 = vmatmul.mubr.msk.bf16.vlgmr.msra.gmra.mxu0 %vm59_vm1, %v35_v6  ;;  %v408_v56 = vld [vmem:[%s656_s8] ss:$0 sm:$0xff] }
   0xb   :  { %468 = vmatprep.mubr.msk.bf16.mxu0 %vm499_vm0, %v498_v0  ;;  %445 = vmatpush3.bf16.msra.mxu1 %v486_v8 }
   0xc   :  { %446 = vmatprep.subr.bf16.mxu1 %v498_v0  ;;  %461 = vmatpush3.bf16.msra.mxu0 %v492_v14 }
   0xd   :  { %462 = vmatprep.subr.bf16.mxu0 %v498_v0 }
   0xf   :  { %447 = vmatpush3.bf16.msra.mxu1 %v487_v9 }
  0x10   :  { %448 = vmatprep.subr.bf16.mxu1 %v498_v0  ;;  %463 = vmatpush3.bf16.msra.mxu0 %v493_v27 }
  0x11   :  { %464 = vmatprep.subr.bf16.mxu0 %v498_v0 }
  0x13   :  { %449 = vmatpush3.bf16.msra.mxu1 %v488_v10 }
  0x14   :  { %450 = vmatprep.subr.bf16.mxu1 %v498_v0  ;;  %465 = vmatpush3.bf16.msra.mxu0 %v494_v28 }
  0x15   :  { %466 = vmatprep.subr.bf16.mxu0 %v498_v0 }
  0x17   :  { %451 = vmatpush3.bf16.msra.mxu1 %v489_v11 }
  0x18   :  { %452 = vmatprep.subr.bf16.mxu1 %v498_v0  ;;  %467 = vmatpush3.bf16.msra.mxu0 %v495_v29 }
  0x19   :  { %472 = vmatprep.subr.bf16.mxu0 %v498_v0 }
  0x1b   :  { %453 = vmatpush3.bf16.msra.mxu1 %v490_v12 }
  0x1c   :  { %454 = vmatprep.subr.bf16.mxu1 %v498_v0 }
  0x1f   :  { %455 = vmatpush3.bf16.msra.mxu1 %v491_v13 }
  0xca   :  { %v97_v16 = vpop.f32.mrf.mxu0 }
  0xcb   :  { %v98_v17 = vadd.f32 %v389_v15, %v97_v16 }
  0xcc   :  { %v438_v18 = vpop.f32.mrf.mxu0 }
  0xcd   :  { %v104_v20 = vmul.f32 0.1, %v98_v17 }
  0xce   :  { %v100_v19 = vpop.f32.mrf.mxu0 }
  0xcf   :  { %v101_v21 = vadd.f32 %v389_v15, %v100_v19  ;;  %v106_v24 = vmax.f32 %v98_v17, %v104_v20 }
  0xd0   :  { %v439_v22 = vpop.f32.mrf.mxu0 }
  0xd1   :  { %v105_v23 = vmul.f32 0.1, %v101_v21 }
  0xd3   :  { %v107_v25 = vmax.f32 %v101_v21, %v105_v23 }
  0xd5   :  { %v108_v26 = vpack.c.bf16 %v107_v25, %v106_v24 }
  0xd7   :  { %457 = vmatmul.mubr.bf16.vlgmr.msra.gmra.mxu1 %v108_v26 }
 0x197   :  { %v214_v31 = vpop.f32.mrf.mxu1 }
 0x198   :  { %v215_v32 = vadd.f32 %v393_v30, %v214_v31 }
 0x199   :  { %v458_v33 = vpop.f32.mrf.mxu1 }
 0x19a   :  { %v221_v35 = vmul.f32 0.1, %v215_v32 }
 0x19b   :  { %v217_v34 = vpop.f32.mrf.mxu1 }
 0x19c   :  { %v218_v36 = vadd.f32 %v393_v30, %v217_v34  ;;  %v223_v39 = vmax.f32 %v215_v32, %v221_v35 }
 0x19d   :  { %v459_v37 = vpop.f32.mrf.mxu1 }
 0x19e   :  { %v222_v38 = vmul.f32 0.1, %v218_v36 }
 0x1a0   :  { %v224_v40 = vmax.f32 %v218_v36, %v222_v38 }
 0x1a2   :  { %v225_v41 = vpack.c.bf16 %v224_v40, %v223_v39 }
 0x1a4   :  { %469 = vmatmul.mubr.msk.bf16.vlgmr.msra.gmra.mxu0 %vm265_vm2, %v225_v41 }
 0x1a5   :  { %476 = vmatprep.mubr.msk.bf16.mxu0 %vm499_vm0, %v498_v0  ;;  %473 = vmatpush3.bf16.msra.mxu0 %v496_v42 }
 0x1a6   :  { %474 = vmatprep.subr.bf16.mxu0 %v498_v0 }
 0x1a9   :  { %475 = vmatpush3.bf16.msra.mxu0 %v497_v43 }
 0x264   :  { %v303_v45 = vpop.f32.mrf.mxu0 }
 0x265   :  { %v304_v46 = vadd.f32 %v402_v44, %v303_v45 }
 0x266   :  { %v470_v47 = vpop.f32.mrf.mxu0 }
 0x267   :  { %v310_v49 = vmul.f32 0.1, %v304_v46 }
 0x268   :  { %v306_v48 = vpop.f32.mrf.mxu0 }
 0x269   :  { %v307_v50 = vadd.f32 %v402_v44, %v306_v48  ;;  %v312_v53 = vmax.f32 %v304_v46, %v310_v49 }
 0x26a   :  { %v471_v51 = vpop.f32.mrf.mxu0 }
 0x26b   :  { %v311_v52 = vmul.f32 0.1, %v307_v50 }
 0x26d   :  { %v313_v54 = vmax.f32 %v307_v50, %v311_v52 }
 0x26f   :  { %v314_v55 = vpack.c.bf16 %v313_v54, %v312_v53 }
 0x271   :  { %477 = vmatmul.mubr.msk.bf16.vlgmr.msra.gmra.mxu0 %vm59_vm1, %v314_v55 }
 0x331   :  { %v375_v57 = vpop.f32.mrf.mxu0 }
 0x332   :  { %v376_v58 = vadd.f32 %v408_v56, %v375_v57 }
 0x333   :  { %v478_v59 = vpop.f32.mrf.mxu0 }
 0x334   :  { %383 = vst.msk [vmem:[%s657_s9] sm:$0xff] %vm382_vm3, %v376_v58 }
 0x335   :  { %v378_v60 = vpop.f32.mrf.mxu0 }
 0x336   :  { %v379_v61 = vadd.f32 %v408_v56, %v378_v60 }
 0x337   :  { %v479_v62 = vpop.f32.mrf.mxu0 }
 0x338   :  { %384 = vst.msk [vmem:[%s657_s9 + $0x8] sm:$0xff] %vm382_vm3, %v379_v61 }

</bundles_post_ra>
